<compile_context>
chip_gen: v7x
topology: tpu7x:2x2x1
jax: 0.10.0
libtpu: 0.0.40
codegen_flags: <defaults>
</compile_context>

<pallas_src>
import functools
from typing import NamedTuple

import jax
import jax.numpy as jnp
from jax.experimental import pallas as pl
from jax.experimental.pallas import tpu as pltpu


def _round_up(x, m):
    return (x + m - 1) // m * m


def _pad2(x, rows, cols):
    return jnp.pad(x, ((0, rows - x.shape[0]), (0, cols - x.shape[1])))


def _vmem_limit(*buffer_bytes):
    # 2x headroom over the explicit buffer budget, at least the 32 MiB default,
    # capped at 48 MiB so it stays inside v7x's 64 MiB physical VMEM.
    est = sum(buffer_bytes)
    return int(min(48 * 1024 * 1024, max(32 * 1024 * 1024, 2 * est)))


def _batch_tile_cap():
    # 512-row batch tiles on >=100 MiB VMEM parts (v5e/v6e have 128 MiB),
    # 256 otherwise (v7x has 64 MiB). Falls back conservatively if the query
    # is unavailable.
    try:
        vmem_bytes = pltpu.get_tpu_info().vmem_capacity_bytes
    except Exception:
        vmem_bytes = 64 * 1024 * 1024
    return 512 if vmem_bytes >= 100 * 1024 * 1024 else 256


class PackedNNLM(NamedTuple):
    """One-time prepacked weights (compute at model-load time, reuse per call)."""
    H_p: jax.Array    # (K_pad, NH_pad)          bf16
    d_p: jax.Array    # (1, NH_pad)              f32
    WU_p: jax.Array   # (K_pad + NH_pad, NC_pad) bf16  rows = [W ; U]
    b_p: jax.Array    # (1, NC_pad)              f32


def prepack_nnlm_weights(W, b, H, d, U):
    K, n_hidden = H.shape
    n_classes = W.shape[1]
    K_pad = _round_up(K, 128)
    NH_pad = _round_up(n_hidden, 128)
    nc128 = _round_up(n_classes, 128)
    # Pad classes up to a multiple of 512 when large enough so the class tile
    # can be 512 wide (fewer grid steps, bigger weight DMAs).
    NC_pad = _round_up(n_classes, 512) if nc128 >= 512 else nc128

    H_p = _pad2(H, K_pad, NH_pad).astype(jnp.bfloat16)
    d_p = _pad2(d.reshape(1, n_hidden), 1, NH_pad).astype(jnp.float32)
    WU_p = jnp.concatenate(
        [_pad2(W, K_pad, NC_pad), _pad2(U, NH_pad, NC_pad)], axis=0
    ).astype(jnp.bfloat16)
    b_p = _pad2(b.reshape(1, n_classes), 1, NC_pad).astype(jnp.float32)
    return PackedNNLM(H_p=H_p, d_p=d_p, WU_p=WU_p, b_p=b_p)


def _hidden_kernel(x_ref, h_ref, d_ref, xh_ref, *, k_pad):
    # x_ref : (TM, K_pad)            bf16   per batch tile
    # h_ref : (K_pad, NH_pad)        bf16   resident (constant index map)
    # d_ref : (1, NH_pad)            f32    resident
    # xh_ref: (TM, K_pad + NH_pad)   bf16   -> [ x | tanh(x @ H + d) ]
    x = x_ref[...]
    hidden = jnp.tanh(
        jnp.dot(x, h_ref[...], preferred_element_type=jnp.float32) + d_ref[...]
    )
    xh_ref[:, :k_pad] = x
    xh_ref[:, k_pad:] = hidden.astype(xh_ref.dtype)


def _logits_kernel(xh_ref, wu_ref, b_ref, out_ref):
    # out = b + [x | hidden] @ [W ; U] : one MXU dot per lane-dense output tile.
    # No cross-iteration state, so both grid axes are safe to shard.
    out_ref[...] = b_ref[...] + jnp.dot(
        xh_ref[...], wu_ref[...], preferred_element_type=jnp.float32
    )


def _nnlm_forward(tokens, C, packed):
    """tokens: (B, n_step) int32, C: (n_classes, emb) f32, packed: PackedNNLM.

    Returns logits (B, n_classes) float32.
    """
    H_p, d_p, WU_p, b_p = packed
    B, n_step = tokens.shape
    n_classes, emb = C.shape
    K = n_step * emb
    K_pad, NH_pad = H_p.shape
    KWU, NC_pad = WU_p.shape          # KWU == K_pad + NH_pad

    TN = 512 if NC_pad % 512 == 0 else (256 if NC_pad % 256 == 0 else 128)

    # Batch tiling: as few tiles as possible (weight traffic = n_bt * |WU|)
    # with minimal row padding (e.g. B=130 -> one 136-row tile, not 256).
    cap = _batch_tile_cap()
    B8 = _round_up(B, 8)
    n_bt = -(-B8 // cap)
    TM = _round_up(-(-B8 // n_bt), 8)
    B_pad = n_bt * TM
    n_ct = NC_pad // TN

    # Embedding lookup + flatten (glue; see TODO about in-kernel gather).
    X = jnp.take(C, tokens, axis=0).reshape(B, K)
    X_p = _pad2(X, B_pad, K_pad).astype(jnp.bfloat16)

    # ---- Kernel A: XH = [x | tanh(x @ H + d)] per batch tile ----------------
    vmem_a = _vmem_limit(
        2 * TM * K_pad * 2,       # X (double-buffered)
        2 * K_pad * NH_pad * 2,   # H (resident; default double-buffered)
        2 * 8 * NH_pad * 4,       # d
        2 * TM * KWU * 2,         # XH out
    )
    xh = pl.pallas_call(
        functools.partial(_hidden_kernel, k_pad=K_pad),
        out_shape=jax.ShapeDtypeStruct((B_pad, KWU), jnp.bfloat16),
        grid=(n_bt,),
        in_specs=[
            pl.BlockSpec((TM, K_pad), lambda i: (i, 0)),      # X
            pl.BlockSpec((K_pad, NH_pad), lambda i: (0, 0)),  # H (resident)
            pl.BlockSpec((1, NH_pad), lambda i: (0, 0)),      # d (resident)
        ],
        out_specs=pl.BlockSpec((TM, KWU), lambda i: (i, 0)),
        compiler_params=pltpu.CompilerParams(
            dimension_semantics=("parallel",),
            vmem_limit_bytes=vmem_a,
        ),
    )(X_p, H_p, d_p)

    # ---- Kernel B: out = b + XH @ [W ; U] over (batch, class) tiles ---------
    vmem_b = _vmem_limit(
        2 * TM * KWU * 2,         # XH (resident per batch tile)
        2 * KWU * TN * 2,         # [W;U] stream (double-buffered)
        2 * 8 * TN * 4,           # b
        2 * TM * TN * 4,          # out
    )
    out_pad = pl.pallas_call(
        _logits_kernel,
        out_shape=jax.ShapeDtypeStruct((B_pad, NC_pad), jnp.float32),
        grid=(n_bt, n_ct),
        in_specs=[
            pl.BlockSpec((TM, KWU), lambda i, j: (i, 0)),     # XH (resident per i)
            pl.BlockSpec((KWU, TN), lambda i, j: (0, j)),     # [W;U] stream
            pl.BlockSpec((1, TN), lambda i, j: (0, j)),       # b stream (f32 add)
        ],
        out_specs=pl.BlockSpec((TM, TN), lambda i, j: (i, j)),
        compiler_params=pltpu.CompilerParams(
            # No scratch carry across iterations, so BOTH axes are parallel:
            # v7x megacore can shard the class axis even when n_bt == 1.
            dimension_semantics=("parallel", "parallel"),
            vmem_limit_bytes=vmem_b,
        ),
    )(xh, WU_p, b_p)

    return out_pad[:B, :n_classes]


nnlm_forward = jax.jit(_nnlm_forward)


if __name__ == "__main__":
    # Small shapes consistent with the module.
    batch = 2
    n_step = 8
    embedding_size = 16
    n_hidden = 32
    n_classes = 64

    key = jax.random.PRNGKey(0)
    k_emb, k_w, k_h, k_d, k_u, k_tok = jax.random.split(key, 6)

    # torch.nn.Embedding default init ~ N(0, 1); torch.rand ~ U[0, 1); b = zeros.
    C = jax.random.normal(k_emb, (n_classes, embedding_size), dtype=jnp.float32)
    W = jax.random.uniform(k_w, (n_step * embedding_size, n_classes), dtype=jnp.float32)
    b = jnp.zeros((n_classes,), dtype=jnp.float32)
    H = jax.random.uniform(k_h, (n_step * embedding_size, n_hidden), dtype=jnp.float32)
    d = jax.random.uniform(k_d, (n_hidden,), dtype=jnp.float32)
    U = jax.random.uniform(k_u, (n_hidden, n_classes), dtype=jnp.float32)

    tokens = jax.random.randint(k_tok, (batch, n_step), 0, n_classes, dtype=jnp.int32)

    # One-time (model-load-time) weight prepacking; reused across forward calls.
    packed = prepack_nnlm_weights(W, b, H, d, U)

    out = nnlm_forward(tokens, C, packed)
    out = jax.block_until_ready(out)

    # Pure-JAX references.
    X_ref = jnp.take(C, tokens, axis=0).reshape(batch, n_step * embedding_size)
    ref_f32 = b + X_ref @ W + jnp.tanh(X_ref @ H + d) @ U

    # bf16-emulated reference matching the kernel's dtypes (tight check).
    q = lambda a: a.astype(jnp.bfloat16).astype(jnp.float32)
    hid_q = jnp.tanh(q(X_ref) @ q(H) + d)
    ref_q = b + q(X_ref) @ q(W) + q(hid_q) @ q(U)

    assert out.shape == (batch, n_classes)
    assert jnp.allclose(out, ref_q, rtol=2e-2, atol=2e-2), "mismatch vs bf16-emulated ref"
    assert jnp.allclose(out, ref_f32, rtol=5e-2, atol=2e-1), "mismatch vs f32 ref"

    print("KERNEL_OK")
</pallas_src>

<mosaic_0001>
module attributes {stable_mosaic.version = 11 : i64} {
  func.func @_logits_kernel(%arg0: i32, %arg1: i32, %arg2: memref<8x256xbf16, #tpu.memory_space<vmem>>, %arg3: memref<256x128xbf16, #tpu.memory_space<vmem>>, %arg4: memref<1x128xf32, #tpu.memory_space<vmem>>, %arg5: memref<8x128xf32, #tpu.memory_space<vmem>>) attributes {dimension_semantics = [#tpu.dimension_semantics<parallel>, #tpu.dimension_semantics<parallel>], iteration_bounds = array<i64: 1, 1>, scalar_prefetch = 0 : i64, scratch_operands = 0 : i64, tpu.core_type = #tpu.core_type<tc>, window_params = [{transform_indices = @transform_0, window_bounds = array<i64: 8, 256>}, {transform_indices = @transform_1, window_bounds = array<i64: 256, 128>}, {transform_indices = @transform_2, window_bounds = array<i64: 1, 128>}, {transform_indices = @transform_3, window_bounds = array<i64: 8, 128>}]} {
    %c0 = arith.constant 0 : index
    %c0_0 = arith.constant 0 : index
    %0 = vector.load %arg4[%c0, %c0_0] : memref<1x128xf32, #tpu.memory_space<vmem>>, vector<1x128xf32>
    %c0_1 = arith.constant 0 : index
    %c0_2 = arith.constant 0 : index
    %1 = vector.load %arg2[%c0_1, %c0_2] : memref<8x256xbf16, #tpu.memory_space<vmem>>, vector<8x256xbf16>
    %c0_3 = arith.constant 0 : index
    %c0_4 = arith.constant 0 : index
    %2 = vector.load %arg3[%c0_3, %c0_4] : memref<256x128xbf16, #tpu.memory_space<vmem>>, vector<256x128xbf16>
    %cst = arith.constant dense<0.000000e+00> : vector<8x128xf32>
    %3 = tpu.matmul %1, %2, %cst {dimension_numbers = #tpu.dot_dimension_numbers<[1], [0], [0], [1], [0, 0, 1, 1], [], []>} : vector<8x256xbf16>, vector<256x128xbf16>, vector<8x128xf32> -> vector<8x128xf32>
    %4 = vector.broadcast %0 : vector<1x128xf32> to vector<8x128xf32>
    %5 = arith.addf %4, %3 : vector<8x128xf32>
    %c0_5 = arith.constant 0 : index
    %c0_6 = arith.constant 0 : index
    %6 = vector.load %arg5[%c0_5, %c0_6] : memref<8x128xf32, #tpu.memory_space<vmem>>, vector<8x128xf32>
    tpu.vector_store %arg5[%c0_5, %c0_6], %5 {strides = array<i32>} : memref<8x128xf32, #tpu.memory_space<vmem>>, vector<8x128xf32>,
    return
  }
  func.func @transform_0(%arg0: i32, %arg1: i32) -> (i32, i32) {
    %c0_i32 = arith.constant 0 : i32
    %c0_i32_0 = arith.constant 0 : i32
    return %arg0, %c0_i32 : i32, i32
  }
  func.func @transform_1(%arg0: i32, %arg1: i32) -> (i32, i32) {
    %c0_i32 = arith.constant 0 : i32
    %c0_i32_0 = arith.constant 0 : i32
    return %c0_i32, %arg1 : i32, i32
  }
  func.func @transform_2(%arg0: i32, %arg1: i32) -> (i32, i32) {
    %c0_i32 = arith.constant 0 : i32
    %c0_i32_0 = arith.constant 0 : i32
    return %c0_i32, %arg1 : i32, i32
  }
  func.func @transform_3(%arg0: i32, %arg1: i32) -> (i32, i32) {
    %c0_i32 = arith.constant 0 : i32
    return %arg0, %arg1 : i32, i32
  }
}

module attributes {stable_mosaic.version = 11 : i64} {
  func.func @_hidden_kernel(%arg0: i32, %arg1: memref<8x128xbf16, #tpu.memory_space<vmem>>, %arg2: memref<128x128xbf16, #tpu.memory_space<vmem>>, %arg3: memref<1x128xf32, #tpu.memory_space<vmem>>, %arg4: memref<8x256xbf16, #tpu.memory_space<vmem>>) attributes {dimension_semantics = [#tpu.dimension_semantics<parallel>], iteration_bounds = array<i64: 1>, scalar_prefetch = 0 : i64, scratch_operands = 0 : i64, tpu.core_type = #tpu.core_type<tc>, window_params = [{transform_indices = @transform_0, window_bounds = array<i64: 8, 128>}, {pipeline_mode = #tpu.pipeline_mode<synchronous>, transform_indices = @transform_1, window_bounds = array<i64: 128, 128>}, {pipeline_mode = #tpu.pipeline_mode<synchronous>, transform_indices = @transform_2, window_bounds = array<i64: 1, 128>}, {transform_indices = @transform_3, window_bounds = array<i64: 8, 256>}]} {
    %c0 = arith.constant 0 : index
    %c0_0 = arith.constant 0 : index
    %0 = vector.load %arg1[%c0, %c0_0] : memref<8x128xbf16, #tpu.memory_space<vmem>>, vector<8x128xbf16>
    %c0_1 = arith.constant 0 : index
    %c0_2 = arith.constant 0 : index
    %1 = vector.load %arg2[%c0_1, %c0_2] : memref<128x128xbf16, #tpu.memory_space<vmem>>, vector<128x128xbf16>
    %cst = arith.constant dense<0.000000e+00> : vector<8x128xf32>
    %2 = tpu.matmul %0, %1, %cst {dimension_numbers = #tpu.dot_dimension_numbers<[1], [0], [0], [1], [0, 0, 1, 1], [], []>} : vector<8x128xbf16>, vector<128x128xbf16>, vector<8x128xf32> -> vector<8x128xf32>
    %c0_3 = arith.constant 0 : index
    %c0_4 = arith.constant 0 : index
    %3 = vector.load %arg3[%c0_3, %c0_4] : memref<1x128xf32, #tpu.memory_space<vmem>>, vector<1x128xf32>
    %4 = vector.broadcast %3 : vector<1x128xf32> to vector<8x128xf32>
    %5 = arith.addf %2, %4 : vector<8x128xf32>
    %6 = math.tanh %5 : vector<8x128xf32>
    %c0_5 = arith.constant 0 : index
    %c0_6 = arith.constant 0 : index
    %7 = vector.load %arg4[%c0_5, %c0_6] : memref<8x256xbf16, #tpu.memory_space<vmem>>, vector<8x128xbf16>
    tpu.vector_store %arg4[%c0_5, %c0_6], %0 {strides = array<i32>} : memref<8x256xbf16, #tpu.memory_space<vmem>>, vector<8x128xbf16>,
    %8 = arith.truncf %6 : vector<8x128xf32> to vector<8x128xbf16>
    %c0_7 = arith.constant 0 : index
    %c128 = arith.constant 128 : index
    %9 = vector.load %arg4[%c0_7, %c128] : memref<8x256xbf16, #tpu.memory_space<vmem>>, vector<8x128xbf16>
    tpu.vector_store %arg4[%c0_7, %c128], %8 {strides = array<i32>} : memref<8x256xbf16, #tpu.memory_space<vmem>>, vector<8x128xbf16>,
    return
  }
  func.func @transform_0(%arg0: i32) -> (i32, i32) {
    %c0_i32 = arith.constant 0 : i32
    %c0_i32_0 = arith.constant 0 : i32
    return %arg0, %c0_i32 : i32, i32
  }
  func.func @transform_1(%arg0: i32) -> (i32, i32) {
    %c0_i32 = arith.constant 0 : i32
    %c0_i32_0 = arith.constant 0 : i32
    %c0_i32_1 = arith.constant 0 : i32
    return %c0_i32, %c0_i32_0 : i32, i32
  }
  func.func @transform_2(%arg0: i32) -> (i32, i32) {
    %c0_i32 = arith.constant 0 : i32
    %c0_i32_0 = arith.constant 0 : i32
    %c0_i32_1 = arith.constant 0 : i32
    return %c0_i32, %c0_i32_0 : i32, i32
  }
  func.func @transform_3(%arg0: i32) -> (i32, i32) {
    %c0_i32 = arith.constant 0 : i32
    %c0_i32_0 = arith.constant 0 : i32
    return %arg0, %c0_i32 : i32, i32
  }
}

</mosaic_0001>

<bundles_post_ra>
// kernel: _nnlm_forward.3
= control target key start
LH: loop header
LB: loop body
LE: loop exit
PB: predicated region body
PF: predicated region fallthrough
CT: control target
= control target key end

     0   :  { %s340_s1 = inlined_call_operand.vmem [shape: bf16[256,128], index: 1, kind: input, shape index: {}]   ;;  %s341_s0 = inlined_call_operand.vmem [shape: bf16[8,256], index: 0, kind: input, shape index: {}]   ;;  %s342_s2 = inlined_call_operand.vmem [shape: f32[1,128], index: 2, kind: input, shape index: {}]   ;;  %s343_s3 = inlined_call_operand.vmem [shape: f32[8,128], index: 3, kind: output, shape index: {}]  }
   0x1   :  { %v245_v0 = vld [vmem:[%s340_s1 + $0x40] sm:$0xff]   ;;  %v247_v2 = vld [vmem:[%s340_s1 + $0x48] sm:$0xff]   ;;  %v249_v4 = vld [vmem:[%s340_s1 + $0x50] sm:$0xff]  }
   0x2   :  { %v246_v1 = vld [vmem:[%s340_s1] sm:$0xff]   ;;  %223 = vmatprep.subr.bf16.mxu0 %v245_v0  ;;  %v248_v3 = vld [vmem:[%s340_s1 + $0x8] sm:$0xff]   ;;  %v250_v5 = vld [vmem:[%s340_s1 + $0x10] sm:$0xff]  }
   0x3   :  { %224 = vmatpush3.bf16.msra.mxu0 %v246_v1  ;;  %v251_v6 = vld [vmem:[%s340_s1 + $0x58] sm:$0xff]   ;;  %v253_v8 = vld [vmem:[%s340_s1 + $0x60] sm:$0xff]   ;;  %v255_v10 = vld [vmem:[%s340_s1 + $0x68] sm:$0xff]  }
   0x4   :  { %225 = vmatprep.subr.bf16.mxu0 %v247_v2  ;;  %v252_v7 = vld [vmem:[%s340_s1 + $0x18] sm:$0xff]   ;;  %v254_v9 = vld [vmem:[%s340_s1 + $0x20] sm:$0xff]   ;;  %v256_v13 = vld [vmem:[%s340_s1 + $0x28] sm:$0xff]  }
   0x5   :  { %v16_v11 = vld [vmem:[%s341_s0] sm:$0xff]  ;;  %v257_v14 = vld [vmem:[%s340_s1 + $0x70] sm:$0xff]   ;;  %v259_v16 = vld [vmem:[%s340_s1 + $0x78] sm:$0xff]  }
   0x6   :  { %v205_v12 = vcombine.high %v16_v11, %v16_v11  ;;  %v258_v15 = vld [vmem:[%s340_s1 + $0x30] sm:$0xff]   ;;  %v260_v17 = vld [vmem:[%s340_s1 + $0x38] sm:$0xff]   ;;  %v204_v18 = vcombine.low %v16_v11, %v16_v11  ;;  %v222_v20 = vld [vmem:[%s342_s2] ss:$0 sm:$0xff] }
   0x7   :  { %226 = vmatpush3.bf16.msra.mxu0 %v248_v3 }
   0x8   :  { %227 = vmatprep.subr.bf16.mxu0 %v249_v4  ;;  %184 = vmatprep.mubr.bf16.mxu0 %v205_v12 }
   0xb   :  { %228 = vmatpush3.bf16.msra.mxu0 %v250_v5 }
   0xc   :  { %229 = vmatprep.subr.bf16.mxu0 %v251_v6 }
   0xf   :  { %230 = vmatpush3.bf16.msra.mxu0 %v252_v7 }
  0x10   :  { %231 = vmatprep.subr.bf16.mxu0 %v253_v8 }
  0x13   :  { %232 = vmatpush3.bf16.msra.mxu0 %v254_v9 }
  0x14   :  { %233 = vmatprep.subr.bf16.mxu0 %v255_v10 }
  0x17   :  { %234 = vmatpush3.bf16.msra.mxu0 %v256_v13 }
  0x18   :  { %235 = vmatprep.subr.bf16.mxu0 %v257_v14 }
  0x1b   :  { %236 = vmatpush3.bf16.msra.mxu0 %v258_v15 }
  0x1c   :  { %237 = vmatprep.subr.bf16.mxu0 %v259_v16 }
  0x1f   :  { %238 = vmatpush3.bf16.msra.mxu0 %v260_v17 }
  0x22   :  { %185 = vmatmul.mubr.bf16.vlgmr.msra.gmra.mrb[0].mxu0 %v204_v18 }
  0xf5   :  { %v239_v19 = vpop.f32.mrb[0].mxu0 }
  0xf6   :  { %v240_v21 = vpop.f32.mrb[1].mxu0 }
  0xf7   :  { %v241_v22 = vadd.f32 %v240_v21, %v239_v19  ;;  %v242_v23 = vpop.f32.mrb[2].mxu0 }
  0xf8   :  { %v243_v24 = vpop.f32.mrb[3].mxu0 }
  0xf9   :  { %v198_v25 = vadd.f32 %v241_v22, %v222_v20 }
  0xfb   :  { %199 = vst [vmem:[%s343_s3] sm:$0xff] %v198_v25 }

// kernel: _nnlm_forward.2
= control target key start
LH: loop header
LB: loop body
LE: loop exit
PB: predicated region body
PF: predicated region fallthrough
CT: control target
= control target key end

     0   :  { %v185_v0 = vmov 0.0   ;;  %vm186_vm0 = vmmov 0   ;;  %s243_s1 = inlined_call_operand.vmem [shape: bf16[128,128], index: 1, kind: input, shape index: {}]   ;;  %s244_s0 = inlined_call_operand.vmem [shape: bf16[8,128], index: 0, kind: input, shape index: {}]   ;;  %s245_s3 = inlined_call_operand.vmem [shape: bf16[8,256], index: 3, kind: output, shape index: {}]   ;;  %s246_s2 = inlined_call_operand.vmem [shape: f32[1,128], index: 2, kind: input, shape index: {}]  }
   0x1   :  { %153 = vmatprep.subr.bf16.mxu0 %v185_v0  ;;  %v175_v1 = vld [vmem:[%s243_s1] sm:$0xff]   ;;  %169 = vmatprep.mubr.msk.bf16.mxu0 %vm186_vm0, %v185_v0  ;;  %v176_v2 = vld [vmem:[%s243_s1 + $0x8] sm:$0xff]   ;;  %v177_v3 = vld [vmem:[%s243_s1 + $0x10] sm:$0xff]  }
   0x2   :  { %154 = vmatpush3.bf16.msra.mxu0 %v175_v1  ;;  %v15_v4 = vld [vmem:[%s244_s0] sm:$0xf]  ;;  %v178_v5 = vld [vmem:[%s243_s1 + $0x18] sm:$0xff]   ;;  %v180_v7 = vld [vmem:[%s243_s1 + $0x28] sm:$0xff]  }
   0x3   :  { %155 = vmatprep.subr.bf16.mxu0 %v185_v0  ;;  %128 = vst [vmem:[%s245_s3] sm:$0xf] %v15_v4  ;;  %v179_v6 = vld [vmem:[%s243_s1 + $0x20] sm:$0xff]   ;;  %v181_v8 = vld [vmem:[%s243_s1 + $0x30] sm:$0xff]   ;;  %v182_v9 = vld [vmem:[%s243_s1 + $0x38] sm:$0xff]  }
   0x4   :  { %v135_v10 = vld [vmem:[%s246_s2] ss:$0 sm:$0xff] }
   0x6   :  { %156 = vmatpush3.bf16.msra.mxu0 %v176_v2 }
   0x7   :  { %157 = vmatprep.subr.bf16.mxu0 %v185_v0 }
   0xa   :  { %158 = vmatpush3.bf16.msra.mxu0 %v177_v3 }
   0xb   :  { %159 = vmatprep.subr.bf16.mxu0 %v185_v0 }
   0xe   :  { %160 = vmatpush3.bf16.msra.mxu0 %v178_v5 }
   0xf   :  { %161 = vmatprep.subr.bf16.mxu0 %v185_v0 }
  0x12   :  { %162 = vmatpush3.bf16.msra.mxu0 %v179_v6 }
  0x13   :  { %163 = vmatprep.subr.bf16.mxu0 %v185_v0 }
  0x16   :  { %164 = vmatpush3.bf16.msra.mxu0 %v180_v7 }
  0x17   :  { %165 = vmatprep.subr.bf16.mxu0 %v185_v0 }
  0x1a   :  { %166 = vmatpush3.bf16.msra.mxu0 %v181_v8 }
  0x1b   :  { %167 = vmatprep.subr.bf16.mxu0 %v185_v0 }
  0x1e   :  { %168 = vmatpush3.bf16.msra.mxu0 %v182_v9 }
  0x21   :  { %170 = vmatmul.mubr.bf16.vlgmr.msra.gmra.mrb[0].mxu0 %v15_v4 }
  0xf4   :  { %v121_v11 = vpop.f32.mrb[0].mxu0 }
  0xf5   :  { %v122_v12 = vadd.f32 %v135_v10, %v121_v11  ;;  %v171_v13 = vpop.f32.mrb[1].mxu0 }
  0xf6   :  { %v124_v14 = vpop.f32.mrb[2].mxu0 }
  0xf7   :  { %183 = vtanh.f32 %v122_v12  ;;  %v172_v15 = vpop.f32.mrb[3].mxu0 }
 0x101   :  { %v184_v16 = vpop.eup %183 }
 0x102   :  { %v129_v17 = vpack.c.bf16 %v184_v16, %v184_v16 }
 0x104   :  { %130 = vst [vmem:[%s245_s3 + $0x4] sm:$0xf] %v129_v17 }

</bundles_post_ra>
